<compile_context>
chip_gen: v5e
topology: v5e:2x2
jax: 0.10.0
libtpu: 0.0.40
codegen_flags: <defaults>
</compile_context>

<pallas_src>
import jax
import jax.numpy as jnp
from jax.experimental import pallas as pl
from jax.experimental.pallas import tpu as pltpu

IN_DIM = 784     # 28 * 28, fixed by the module
HIDDEN = 128     # MXU/lane friendly (module default is 500; constructor arg)
ZDIM = 32        # lane friendly (module default is 20; constructor arg)


def _leaky_relu(x, slope=0.2):
    return jnp.where(x > 0, x, slope * x)


def _round_up(n, m):
    return ((n + m - 1) // m) * m


def _vae_kernel(x_ref, w1_ref, b1_ref, wml_ref, bml_ref, eps_ref,
                wd1_ref, bd1_ref, wd2_ref, bd2_ref, out_ref):
    # x tile in f32 (exact values needed for the BCE term); bf16 copy for MXU.
    x = x_ref[...]                                                  # [TB, 784]
    x_bf = x.astype(jnp.bfloat16)

    # ---------------- encoder ----------------
    h = jnp.dot(x_bf, w1_ref[...], preferred_element_type=jnp.float32) + b1_ref[...]
    h = _leaky_relu(h)                                              # [TB, H] f32

    # fused mu|log_var head: one MXU push producing [TB, 2*Z]
    ml = jnp.dot(h.astype(jnp.bfloat16), wml_ref[...],
                 preferred_element_type=jnp.float32) + bml_ref[...]
    mu = ml[:, :ZDIM]                                               # [TB, Z]
    log_var = ml[:, ZDIM:]                                          # [TB, Z]

    # ------------- reparameterize -------------
    # torch: mu + log_var.exp().sqrt() * eps  ==  mu + exp(0.5*log_var) * eps
    std = jnp.exp(0.5 * log_var)
    z = mu + std * eps_ref[...]                                     # [TB, Z]

    # ---------------- decoder ----------------
    hd = jnp.dot(z.astype(jnp.bfloat16), wd1_ref[...],
                 preferred_element_type=jnp.float32) + bd1_ref[...]
    hd = _leaky_relu(hd)                                            # [TB, H]
    logits = jnp.dot(hd.astype(jnp.bfloat16), wd2_ref[...],
                     preferred_element_type=jnp.float32) + bd2_ref[...]

    # ----------------- losses -----------------
    # BCE(sigmoid(l), x) summed == sum(softplus(l) - x*l); stable softplus.
    softplus = jnp.maximum(logits, 0.0) + jnp.log(1.0 + jnp.exp(-jnp.abs(logits)))
    rec_row = jnp.sum(softplus - x * logits, axis=-1)               # [TB]
    # KL(q || N(0, I)) per row; exp(log_var) reused as std*std.
    kl_row = -0.5 * jnp.sum(1.0 + log_var - mu * mu - std * std, axis=-1)
    loss_row = rec_row + kl_row                                     # [TB]

    # lane-dense per-row partial losses; wrapper reads lane 0 of valid rows.
    out_ref[...] = jnp.broadcast_to(loss_row[:, None], out_ref.shape)


def vae_forward(x, params, eps, tb_max=256):
    """x: [B, 1, 28, 28] f32 in [0,1]; eps: [B, ZDIM] N(0,1) noise.
    Returns the scalar negative average ELBO (torch module semantics)."""
    B = x.shape[0]
    x2 = x.reshape(B, IN_DIM).astype(jnp.float32)
    eps = eps.astype(jnp.float32)

    # batch tile: multiple of 8 sublanes, capped (256 feeds full MXU rows).
    TB = min(tb_max, _round_up(B, 8))
    B_pad = _round_up(B, TB)
    if B_pad != B:
        x2 = jnp.pad(x2, ((0, B_pad - B), (0, 0)))
        eps = jnp.pad(eps, ((0, B_pad - B), (0, 0)))
    num_blocks = B_pad // TB

    bf = jnp.bfloat16
    w1 = params["w1"].astype(bf)
    wml = jnp.concatenate([params["wmu"], params["wlv"]], axis=1).astype(bf)
    bml = jnp.concatenate([params["bmu"], params["blv"]], axis=1).astype(jnp.float32)
    wd1 = params["wd1"].astype(bf)
    wd2 = params["wd2"].astype(bf)
    b1 = params["b1"].astype(jnp.float32)
    bd1 = params["bd1"].astype(jnp.float32)
    bd2 = params["bd2"].astype(jnp.float32)

    ins = (x2, w1, b1, wml, bml, eps, wd1, bd1, wd2, bd2)

    def batch_spec(cols):
        return pl.BlockSpec((TB, cols), lambda i: (i, 0))

    def resident_spec(a):
        # full-array block, constant index -> stays in VMEM, DMA'd once.
        return pl.BlockSpec(a.shape, lambda i: (0, 0))

    in_specs = [
        batch_spec(IN_DIM),                         # x
        resident_spec(w1), resident_spec(b1),       # encoder layer 1
        resident_spec(wml), resident_spec(bml),     # fused mu|log_var head
        batch_spec(ZDIM),                           # eps
        resident_spec(wd1), resident_spec(bd1),     # decoder layer 1
        resident_spec(wd2), resident_spec(bd2),     # decoder layer 2
    ]

    flops = 2 * B_pad * (IN_DIM * HIDDEN + HIDDEN * 2 * ZDIM
                         + ZDIM * HIDDEN + HIDDEN * IN_DIM)
    transcendentals = B_pad * (2 * IN_DIM + ZDIM)
    bytes_accessed = (x2.size * 4 + eps.size * 4 + B_pad * 128 * 4 +
                      sum(int(a.size) * a.dtype.itemsize
                          for a in (w1, b1, wml, bml, wd1, bd1, wd2, bd2)))

    out = pl.pallas_call(
        _vae_kernel,
        out_shape=jax.ShapeDtypeStruct((B_pad, 128), jnp.float32),
        grid=(num_blocks,),
        in_specs=in_specs,
        out_specs=pl.BlockSpec((TB, 128), lambda i: (i, 0)),
        compiler_params=pltpu.CompilerParams(
            dimension_semantics=("parallel",)),
        cost_estimate=pl.CostEstimate(flops=flops,
                                      transcendentals=transcendentals,
                                      bytes_accessed=bytes_accessed),
    )(*ins)

    # final reduction over valid rows + divide-by-B in XLA (free).
    return jnp.sum(out[:B, 0]) / B


# ----------------------- pure-JAX references -----------------------

def _reference_forward_f32(x2, params, eps):
    """Exact torch-module semantics in f32 (sigmoid + clamped logs)."""
    B = x2.shape[0]
    h = _leaky_relu(x2 @ params["w1"] + params["b1"])
    mu = h @ params["wmu"] + params["bmu"]
    log_var = h @ params["wlv"] + params["blv"]
    z = mu + jnp.sqrt(jnp.exp(log_var)) * eps
    hd = _leaky_relu(z @ params["wd1"] + params["bd1"])
    x_hat = jax.nn.sigmoid(hd @ params["wd2"] + params["bd2"])
    log_p = jnp.maximum(jnp.log(x_hat), -100.0)
    log_1mp = jnp.maximum(jnp.log(1.0 - x_hat), -100.0)
    rec = -jnp.sum(x2 * log_p + (1.0 - x2) * log_1mp)
    reg = -0.5 * jnp.sum(1.0 + log_var - mu * mu - jnp.exp(log_var))
    return (rec + reg) / B


def _reference_forward_bf16(x2, params, eps):
    """Same math as the kernel (bf16 matmul inputs, logit-space BCE)."""
    B = x2.shape[0]
    bf = jnp.bfloat16

    def dot(a, w):
        return jnp.dot(a.astype(bf), w.astype(bf),
                       preferred_element_type=jnp.float32)

    h = _leaky_relu(dot(x2, params["w1"]) + params["b1"])
    mu = dot(h, params["wmu"]) + params["bmu"]
    log_var = dot(h, params["wlv"]) + params["blv"]
    std = jnp.exp(0.5 * log_var)
    z = mu + std * eps
    hd = _leaky_relu(dot(z, params["wd1"]) + params["bd1"])
    logits = dot(hd, params["wd2"]) + params["bd2"]
    softplus = jnp.maximum(logits, 0.0) + jnp.log(1.0 + jnp.exp(-jnp.abs(logits)))
    rec = jnp.sum(softplus - x2 * logits)
    reg = -0.5 * jnp.sum(1.0 + log_var - mu * mu - std * std)
    return (rec + reg) / B


if __name__ == "__main__":
    key = jax.random.PRNGKey(0)
    keys = jax.random.split(key, 12)

    def linear_init(kw, kb, fan_in, fan_out):
        # PyTorch nn.Linear default init: U(-1/sqrt(fan_in), 1/sqrt(fan_in))
        bound = 1.0 / (fan_in ** 0.5)
        w = jax.random.uniform(kw, (fan_in, fan_out), jnp.float32, -bound, bound)
        b = jax.random.uniform(kb, (1, fan_out), jnp.float32, -bound, bound)
        return w, b

    w1, b1 = linear_init(keys[0], keys[1], IN_DIM, HIDDEN)
    wmu, bmu = linear_init(keys[2], keys[3], HIDDEN, ZDIM)
    wlv, blv = linear_init(keys[4], keys[5], HIDDEN, ZDIM)
    wd1, bd1 = linear_init(keys[6], keys[7], ZDIM, HIDDEN)
    wd2, bd2 = linear_init(keys[8], keys[9], HIDDEN, IN_DIM)
    params = dict(w1=w1, b1=b1, wmu=wmu, bmu=bmu, wlv=wlv, blv=blv,
                  wd1=wd1, bd1=bd1, wd2=wd2, bd2=bd2)

    B = 8
    x = jax.random.uniform(keys[10], (B, 1, 28, 28), jnp.float32, 0.0, 1.0)
    # TODO(synk): torch.randn inside reparameterize/sample has no in-kernel
    # equivalent here; Gaussian noise is generated host-side and passed in.
    eps = jax.random.normal(keys[11], (B, ZDIM), jnp.float32)

    neg_elbo = jax.block_until_ready(vae_forward(x, params, eps))

    x2 = x.reshape(B, IN_DIM)
    ref_bf16 = jax.block_until_ready(_reference_forward_bf16(x2, params, eps))
    ref_f32 = jax.block_until_ready(_reference_forward_f32(x2, params, eps))

    # tight check against the kernel's exact (bf16-matmul) numerics
    assert jnp.allclose(neg_elbo, ref_bf16, rtol=1e-3, atol=5e-2), (neg_elbo, ref_bf16)
    # looser check against the full-f32 torch-semantics reference
    assert jnp.allclose(neg_elbo, ref_f32, rtol=1e-2), (neg_elbo, ref_f32)
    print("KERNEL_OK")
</pallas_src>

<mosaic_0001>
module attributes {stable_mosaic.version = 11 : i64} {
  func.func @_vae_kernel(%arg0: i32, %arg1: memref<8x784xf32, #tpu.memory_space<vmem>>, %arg2: memref<784x128xbf16, #tpu.memory_space<vmem>>, %arg3: memref<1x128xf32, #tpu.memory_space<vmem>>, %arg4: memref<128x64xbf16, #tpu.memory_space<vmem>>, %arg5: memref<1x64xf32, #tpu.memory_space<vmem>>, %arg6: memref<8x32xf32, #tpu.memory_space<vmem>>, %arg7: memref<32x128xbf16, #tpu.memory_space<vmem>>, %arg8: memref<1x128xf32, #tpu.memory_space<vmem>>, %arg9: memref<128x784xbf16, #tpu.memory_space<vmem>>, %arg10: memref<1x784xf32, #tpu.memory_space<vmem>>, %arg11: memref<8x128xf32, #tpu.memory_space<vmem>>) attributes {dimension_semantics = [#tpu.dimension_semantics<parallel>], iteration_bounds = array<i64: 1>, scalar_prefetch = 0 : i64, scratch_operands = 0 : i64, tpu.core_type = #tpu.core_type<tc>, window_params = [{transform_indices = @transform_0, window_bounds = array<i64: 8, 784>}, {pipeline_mode = #tpu.pipeline_mode<synchronous>, transform_indices = @transform_1, window_bounds = array<i64: 784, 128>}, {pipeline_mode = #tpu.pipeline_mode<synchronous>, transform_indices = @transform_2, window_bounds = array<i64: 1, 128>}, {pipeline_mode = #tpu.pipeline_mode<synchronous>, transform_indices = @transform_3, window_bounds = array<i64: 128, 64>}, {pipeline_mode = #tpu.pipeline_mode<synchronous>, transform_indices = @transform_4, window_bounds = array<i64: 1, 64>}, {transform_indices = @transform_5, window_bounds = array<i64: 8, 32>}, {pipeline_mode = #tpu.pipeline_mode<synchronous>, transform_indices = @transform_6, window_bounds = array<i64: 32, 128>}, {pipeline_mode = #tpu.pipeline_mode<synchronous>, transform_indices = @transform_7, window_bounds = array<i64: 1, 128>}, {pipeline_mode = #tpu.pipeline_mode<synchronous>, transform_indices = @transform_8, window_bounds = array<i64: 128, 784>}, {pipeline_mode = #tpu.pipeline_mode<synchronous>, transform_indices = @transform_9, window_bounds = array<i64: 1, 784>}, {transform_indices = @transform_10, window_bounds = array<i64: 8, 128>}]} {
    %c0 = arith.constant 0 : index
    %c0_0 = arith.constant 0 : index
    %0 = vector.load %arg1[%c0, %c0_0] : memref<8x784xf32, #tpu.memory_space<vmem>>, vector<8x784xf32>
    %1 = arith.truncf %0 : vector<8x784xf32> to vector<8x784xbf16>
    %c0_1 = arith.constant 0 : index
    %c0_2 = arith.constant 0 : index
    %2 = vector.load %arg2[%c0_1, %c0_2] : memref<784x128xbf16, #tpu.memory_space<vmem>>, vector<784x128xbf16>
    %cst = arith.constant dense<0.000000e+00> : vector<8x128xf32>
    %3 = tpu.matmul %1, %2, %cst {dimension_numbers = #tpu.dot_dimension_numbers<[1], [0], [0], [1], [0, 0, 1, 1], [], []>} : vector<8x784xbf16>, vector<784x128xbf16>, vector<8x128xf32> -> vector<8x128xf32>
    %c0_3 = arith.constant 0 : index
    %c0_4 = arith.constant 0 : index
    %4 = vector.load %arg3[%c0_3, %c0_4] : memref<1x128xf32, #tpu.memory_space<vmem>>, vector<1x128xf32>
    %5 = vector.broadcast %4 : vector<1x128xf32> to vector<8x128xf32>
    %6 = arith.addf %3, %5 : vector<8x128xf32>
    %cst_5 = arith.constant 0.000000e+00 : f32
    %7 = vector.broadcast %cst_5 : f32 to vector<8x128xf32>
    %8 = arith.cmpf ogt, %6, %7 : vector<8x128xf32>
    %cst_6 = arith.constant 2.000000e-01 : f32
    %9 = vector.broadcast %cst_6 : f32 to vector<8x128xf32>
    %10 = arith.mulf %9, %6 : vector<8x128xf32>
    %11 = arith.select %8, %6, %10 : vector<8x128xi1>, vector<8x128xf32>
    %12 = arith.truncf %11 : vector<8x128xf32> to vector<8x128xbf16>
    %c0_7 = arith.constant 0 : index
    %c0_8 = arith.constant 0 : index
    %13 = vector.load %arg4[%c0_7, %c0_8] : memref<128x64xbf16, #tpu.memory_space<vmem>>, vector<128x64xbf16>
    %cst_9 = arith.constant dense<0.000000e+00> : vector<8x64xf32>
    %14 = tpu.matmul %12, %13, %cst_9 {dimension_numbers = #tpu.dot_dimension_numbers<[1], [0], [0], [1], [0, 0, 1, 1], [], []>} : vector<8x128xbf16>, vector<128x64xbf16>, vector<8x64xf32> -> vector<8x64xf32>
    %c0_10 = arith.constant 0 : index
    %c0_11 = arith.constant 0 : index
    %15 = vector.load %arg5[%c0_10, %c0_11] : memref<1x64xf32, #tpu.memory_space<vmem>>, vector<1x64xf32>
    %16 = vector.broadcast %15 : vector<1x64xf32> to vector<8x64xf32>
    %17 = arith.addf %14, %16 : vector<8x64xf32>
    %18 = vector.extract_strided_slice %17 {offsets = [0, 0], sizes = [8, 32], strides = [1, 1]} : vector<8x64xf32> to vector<8x32xf32>
    %19 = vector.extract_strided_slice %17 {offsets = [0, 32], sizes = [8, 32], strides = [1, 1]} : vector<8x64xf32> to vector<8x32xf32>
    %cst_12 = arith.constant 5.000000e-01 : f32
    %20 = vector.broadcast %cst_12 : f32 to vector<8x32xf32>
    %21 = arith.mulf %20, %19 : vector<8x32xf32>
    %22 = math.exp %21 : vector<8x32xf32>
    %c0_13 = arith.constant 0 : index
    %c0_14 = arith.constant 0 : index
    %23 = vector.load %arg6[%c0_13, %c0_14] : memref<8x32xf32, #tpu.memory_space<vmem>>, vector<8x32xf32>
    %24 = arith.mulf %22, %23 : vector<8x32xf32>
    %25 = arith.addf %18, %24 : vector<8x32xf32>
    %26 = arith.truncf %25 : vector<8x32xf32> to vector<8x32xbf16>
    %c0_15 = arith.constant 0 : index
    %c0_16 = arith.constant 0 : index
    %27 = vector.load %arg7[%c0_15, %c0_16] : memref<32x128xbf16, #tpu.memory_space<vmem>>, vector<32x128xbf16>
    %cst_17 = arith.constant dense<0.000000e+00> : vector<8x128xf32>
    %28 = tpu.matmul %26, %27, %cst_17 {dimension_numbers = #tpu.dot_dimension_numbers<[1], [0], [0], [1], [0, 0, 1, 1], [], []>} : vector<8x32xbf16>, vector<32x128xbf16>, vector<8x128xf32> -> vector<8x128xf32>
    %c0_18 = arith.constant 0 : index
    %c0_19 = arith.constant 0 : index
    %29 = vector.load %arg8[%c0_18, %c0_19] : memref<1x128xf32, #tpu.memory_space<vmem>>, vector<1x128xf32>
    %30 = vector.broadcast %29 : vector<1x128xf32> to vector<8x128xf32>
    %31 = arith.addf %28, %30 : vector<8x128xf32>
    %cst_20 = arith.constant 0.000000e+00 : f32
    %32 = vector.broadcast %cst_20 : f32 to vector<8x128xf32>
    %33 = arith.cmpf ogt, %31, %32 : vector<8x128xf32>
    %cst_21 = arith.constant 2.000000e-01 : f32
    %34 = vector.broadcast %cst_21 : f32 to vector<8x128xf32>
    %35 = arith.mulf %34, %31 : vector<8x128xf32>
    %36 = arith.select %33, %31, %35 : vector<8x128xi1>, vector<8x128xf32>
    %37 = arith.truncf %36 : vector<8x128xf32> to vector<8x128xbf16>
    %c0_22 = arith.constant 0 : index
    %c0_23 = arith.constant 0 : index
    %38 = vector.load %arg9[%c0_22, %c0_23] : memref<128x784xbf16, #tpu.memory_space<vmem>>, vector<128x784xbf16>
    %cst_24 = arith.constant dense<0.000000e+00> : vector<8x784xf32>
    %39 = tpu.matmul %37, %38, %cst_24 {dimension_numbers = #tpu.dot_dimension_numbers<[1], [0], [0], [1], [0, 0, 1, 1], [], []>} : vector<8x128xbf16>, vector<128x784xbf16>, vector<8x784xf32> -> vector<8x784xf32>
    %c0_25 = arith.constant 0 : index
    %c0_26 = arith.constant 0 : index
    %40 = vector.load %arg10[%c0_25, %c0_26] : memref<1x784xf32, #tpu.memory_space<vmem>>, vector<1x784xf32>
    %41 = vector.broadcast %40 : vector<1x784xf32> to vector<8x784xf32>
    %42 = arith.addf %39, %41 : vector<8x784xf32>
    %cst_27 = arith.constant 0.000000e+00 : f32
    %43 = vector.broadcast %cst_27 : f32 to vector<8x784xf32>
    %44 = arith.maximumf %42, %43 : vector<8x784xf32>
    %45 = math.absf %42 : vector<8x784xf32>
    %cst_28 = arith.constant 0.000000e+00 : f32
    %46 = vector.broadcast %cst_28 : f32 to vector<8x784xf32>
    %47 = arith.subf %46, %45 : vector<8x784xf32>
    %48 = math.exp %47 : vector<8x784xf32>
    %cst_29 = arith.constant 1.000000e+00 : f32
    %49 = vector.broadcast %cst_29 : f32 to vector<8x784xf32>
    %50 = arith.addf %49, %48 : vector<8x784xf32>
    %51 = math.log %50 : vector<8x784xf32>
    %52 = arith.addf %44, %51 : vector<8x784xf32>
    %53 = arith.mulf %0, %42 : vector<8x784xf32>
    %54 = arith.subf %52, %53 : vector<8x784xf32>
    %cst_30 = arith.constant dense<0.000000e+00> : vector<8xf32>
    %55 = vector.multi_reduction <add>, %54, %cst_30 [1] : vector<8x784xf32> to vector<8xf32>
    %cst_31 = arith.constant 1.000000e+00 : f32
    %56 = vector.broadcast %cst_31 : f32 to vector<8x32xf32>
    %57 = arith.addf %56, %19 : vector<8x32xf32>
    %58 = arith.mulf %18, %18 : vector<8x32xf32>
    %59 = arith.subf %57, %58 : vector<8x32xf32>
    %60 = arith.mulf %22, %22 : vector<8x32xf32>
    %61 = arith.subf %59, %60 : vector<8x32xf32>
    %cst_32 = arith.constant dense<0.000000e+00> : vector<8xf32>
    %62 = vector.multi_reduction <add>, %61, %cst_32 [1] : vector<8x32xf32> to vector<8xf32>
    %cst_33 = arith.constant -5.000000e-01 : f32
    %63 = vector.broadcast %cst_33 : f32 to vector<8xf32>
    %64 = arith.mulf %63, %62 : vector<8xf32>
    %65 = arith.addf %55, %64 : vector<8xf32>
    %66 = vector.shape_cast %65 : vector<8xf32> to vector<8x1xf32>
    %67 = vector.shape_cast %66 : vector<8x1xf32> to vector<8x1xf32>
    %68 = vector.broadcast %67 : vector<8x1xf32> to vector<8x128xf32>
    %c0_34 = arith.constant 0 : index
    %c0_35 = arith.constant 0 : index
    %69 = vector.load %arg11[%c0_34, %c0_35] : memref<8x128xf32, #tpu.memory_space<vmem>>, vector<8x128xf32>
    tpu.vector_store %arg11[%c0_34, %c0_35], %68 {strides = array<i32>} : memref<8x128xf32, #tpu.memory_space<vmem>>, vector<8x128xf32>,
    return
  }
  func.func @transform_0(%arg0: i32) -> (i32, i32) {
    %c0_i32 = arith.constant 0 : i32
    %c0_i32_0 = arith.constant 0 : i32
    return %arg0, %c0_i32 : i32, i32
  }
  func.func @transform_1(%arg0: i32) -> (i32, i32) {
    %c0_i32 = arith.constant 0 : i32
    %c0_i32_0 = arith.constant 0 : i32
    %c0_i32_1 = arith.constant 0 : i32
    return %c0_i32, %c0_i32_0 : i32, i32
  }
  func.func @transform_2(%arg0: i32) -> (i32, i32) {
    %c0_i32 = arith.constant 0 : i32
    %c0_i32_0 = arith.constant 0 : i32
    %c0_i32_1 = arith.constant 0 : i32
    return %c0_i32, %c0_i32_0 : i32, i32
  }
  func.func @transform_3(%arg0: i32) -> (i32, i32) {
    %c0_i32 = arith.constant 0 : i32
    %c0_i32_0 = arith.constant 0 : i32
    %c0_i32_1 = arith.constant 0 : i32
    return %c0_i32, %c0_i32_0 : i32, i32
  }
  func.func @transform_4(%arg0: i32) -> (i32, i32) {
    %c0_i32 = arith.constant 0 : i32
    %c0_i32_0 = arith.constant 0 : i32
    %c0_i32_1 = arith.constant 0 : i32
    return %c0_i32, %c0_i32_0 : i32, i32
  }
  func.func @transform_5(%arg0: i32) -> (i32, i32) {
    %c0_i32 = arith.constant 0 : i32
    %c0_i32_0 = arith.constant 0 : i32
    return %arg0, %c0_i32 : i32, i32
  }
  func.func @transform_6(%arg0: i32) -> (i32, i32) {
    %c0_i32 = arith.constant 0 : i32
    %c0_i32_0 = arith.constant 0 : i32
    %c0_i32_1 = arith.constant 0 : i32
    return %c0_i32, %c0_i32_0 : i32, i32
  }
  func.func @transform_7(%arg0: i32) -> (i32, i32) {
    %c0_i32 = arith.constant 0 : i32
    %c0_i32_0 = arith.constant 0 : i32
    %c0_i32_1 = arith.constant 0 : i32
    return %c0_i32, %c0_i32_0 : i32, i32
  }
  func.func @transform_8(%arg0: i32) -> (i32, i32) {
    %c0_i32 = arith.constant 0 : i32
    %c0_i32_0 = arith.constant 0 : i32
    %c0_i32_1 = arith.constant 0 : i32
    return %c0_i32, %c0_i32_0 : i32, i32
  }
  func.func @transform_9(%arg0: i32) -> (i32, i32) {
    %c0_i32 = arith.constant 0 : i32
    %c0_i32_0 = arith.constant 0 : i32
    %c0_i32_1 = arith.constant 0 : i32
    return %c0_i32, %c0_i32_0 : i32, i32
  }
  func.func @transform_10(%arg0: i32) -> (i32, i32) {
    %c0_i32 = arith.constant 0 : i32
    %c0_i32_0 = arith.constant 0 : i32
    return %arg0, %c0_i32 : i32, i32
  }
}

</mosaic_0001>

<bundles_post_ra>
// kernel: tpu_custom_call.1
= control target key start
LH: loop header
LB: loop body
LE: loop exit
PB: predicated region body
PF: predicated region fallthrough
CT: control target
= control target key end

     0   :  { %s2588_s0 = inlined_call_operand.vmem [shape: f32[8,784], index: 0, kind: input, shape index: {}]   ;;  %s2589_s1 = inlined_call_operand.vmem [shape: bf16[784,128], index: 1, kind: input, shape index: {}]   ;;  %s2590_s2 = inlined_call_operand.vmem [shape: f32[1,128], index: 2, kind: input, shape index: {}]   ;;  %s2591_s3 = inlined_call_operand.vmem [shape: bf16[128,64], index: 3, kind: input, shape index: {}]   ;;  %s2592_s4 = inlined_call_operand.vmem [shape: f32[1,64], index: 4, kind: input, shape index: {}]   ;;  %s2593_s5 = inlined_call_operand.vmem [shape: f32[8,32], index: 5, kind: input, shape index: {}]   ;;  %s2594_s6 = inlined_call_operand.vmem [shape: bf16[32,128], index: 6, kind: input, shape index: {}]   ;;  %s2595_s7 = inlined_call_operand.vmem [shape: f32[1,128], index: 7, kind: input, shape index: {}]   ;;  %s2596_s8 = inlined_call_operand.vmem [shape: bf16[128,784], index: 8, kind: input, shape index: {}]   ;;  %s2597_s9 = inlined_call_operand.vmem [shape: f32[1,784], index: 9, kind: input, shape index: {}]   ;;  %s2598_s10 = inlined_call_operand.hbm [shape: f32[8,128], index: 10, kind: output, shape index: {}]  }
   0x1   :  { %v1732_v0 = vld [vmem:[%s2589_s1 + $0x38] sm:$0xff]  ;;  %v1731_v3 = vld [vmem:[%s2589_s1 + $0x30] sm:$0xff]  ;;  %v1730_v8 = vld [vmem:[%s2589_s1 + $0x28] sm:$0xff] }
   0x2   :  { %v1740_v1 = vld [vmem:[%s2589_s1 + $0x78] sm:$0xff]  ;;  %451 = vmatpush.bf16.msra.mxu0 %v1732_v0  ;;  %v1739_v4 = vld [vmem:[%s2589_s1 + $0x70] sm:$0xff]  ;;  %v1738_v9 = vld [vmem:[%s2589_s1 + $0x68] sm:$0xff] }
   0x3   :  { %v1748_v2 = vld [vmem:[%s2589_s1 + $0xb8] sm:$0xff]  ;;  %464 = vmatpush.bf16.msra.mxu1 %v1740_v1  ;;  %v1747_v5 = vld [vmem:[%s2589_s1 + $0xb0] sm:$0xff]  ;;  %v1746_v10 = vld [vmem:[%s2589_s1 + $0xa8] sm:$0xff] }
   0x4   :  { %477 = vmatpush.bf16.msra.mxu2 %v1748_v2  ;;  %v1756_v6 = vld [vmem:[%s2589_s1 + $0xf8] sm:$0xff]  ;;  %v1755_v7 = vld [vmem:[%s2589_s1 + $0xf0] sm:$0xff]  ;;  %v1754_v11 = vld [vmem:[%s2589_s1 + $0xe8] sm:$0xff] }
   0x5   :  { %490 = vmatpush.bf16.msra.mxu3 %v1756_v6  ;;  %v1729_v12 = vld [vmem:[%s2589_s1 + $0x20] sm:$0xff]  ;;  %v1728_v16 = vld [vmem:[%s2589_s1 + $0x18] sm:$0xff] }
   0x6   :  { %452 = vmatpush.bf16.msra.mxu0 %v1731_v3  ;;  %v1737_v13 = vld [vmem:[%s2589_s1 + $0x60] sm:$0xff]  ;;  %v1736_v17 = vld [vmem:[%s2589_s1 + $0x58] sm:$0xff] }
   0x7   :  { %465 = vmatpush.bf16.msra.mxu1 %v1739_v4  ;;  %v1745_v14 = vld [vmem:[%s2589_s1 + $0xa0] sm:$0xff]  ;;  %v1744_v18 = vld [vmem:[%s2589_s1 + $0x98] sm:$0xff] }
   0x8   :  { %478 = vmatpush.bf16.msra.mxu2 %v1747_v5  ;;  %v1753_v15 = vld [vmem:[%s2589_s1 + $0xe0] sm:$0xff]  ;;  %v1752_v19 = vld [vmem:[%s2589_s1 + $0xd8] sm:$0xff] }
   0x9   :  { %491 = vmatpush.bf16.msra.mxu3 %v1755_v7 }
   0xa   :  { %453 = vmatpush.bf16.msra.mxu0 %v1730_v8 }
   0xb   :  { %466 = vmatpush.bf16.msra.mxu1 %v1738_v9 }
   0xc   :  { %479 = vmatpush.bf16.msra.mxu2 %v1746_v10 }
   0xd   :  { %492 = vmatpush.bf16.msra.mxu3 %v1754_v11 }
   0xe   :  { %454 = vmatpush.bf16.msra.mxu0 %v1729_v12 }
   0xf   :  { %467 = vmatpush.bf16.msra.mxu1 %v1737_v13 }
  0x10   :  { %480 = vmatpush.bf16.msra.mxu2 %v1745_v14 }
  0x11   :  { %493 = vmatpush.bf16.msra.mxu3 %v1753_v15 }
  0x12   :  { %15 = vsyncpa [#allocation3], 0  ;;  %455 = vmatpush.bf16.msra.mxu0 %v1728_v16  ;;  %v1727_v20 = vld [vmem:[%s2589_s1 + $0x10] sm:$0xff]  ;;  %v1726_v24 = vld [vmem:[%s2589_s1 + $0x8] sm:$0xff]  ;;  %vm447_vm0 = vcmask 130048   ;;  %s1902_s21 = smov 32  }
  0x13   :  { %468 = vmatpush.bf16.msra.mxu1 %v1736_v17  ;;  %v1735_v21 = vld [vmem:[%s2589_s1 + $0x50] sm:$0xff]  ;;  %v1734_v25 = vld [vmem:[%s2589_s1 + $0x48] sm:$0xff]  ;;  %v1725_v27 = vld [vmem:[%s2589_s1] sm:$0xff]  ;;  %vm662_vm2 = vcmask 261120   ;;  %s1254_s18 = sshll.u32 %s2598_s10, 4  ;;  %s1255_s18 = int_to_ptr.hbm [resolvable:$true] %s1254_s18 }
  0x14   :  { %481 = vmatpush.bf16.msra.mxu2 %v1744_v18  ;;  %v1743_v22 = vld [vmem:[%s2589_s1 + $0x90] sm:$0xff]  ;;  %v1742_v26 = vld [vmem:[%s2589_s1 + $0x88] sm:$0xff]  ;;  %v1733_v29 = vld [vmem:[%s2589_s1 + $0x40] sm:$0xff] }
  0x15   :  { %494 = vmatpush.bf16.msra.mxu3 %v1752_v19  ;;  %v1751_v23 = vld [vmem:[%s2589_s1 + $0xd0] sm:$0xff]  ;;  %v1750_v28 = vld [vmem:[%s2589_s1 + $0xc8] sm:$0xff]  ;;  %v2053_v30 = vld [vmem:[%s2588_s0] sm:$0xff] }
  0x16   :  { %456 = vmatpush.bf16.msra.mxu0 %v1727_v20  ;;  %v2058_v31 = vld [vmem:[%s2588_s0 + $0x8] sm:$0xff]  ;;  %v1764_v32 = vld [vmem:[%s2589_s1 + $0x138] sm:$0xff]  ;;  %v1741_v34 = vld [vmem:[%s2589_s1 + $0x80] sm:$0xff]  ;;  %v44_v36 = vpack.c.bf16 %v2053_v30, %v2053_v30 }
  0x17   :  { %469 = vmatpush.bf16.msra.mxu1 %v1735_v21  ;;  %v1772_v33 = vld [vmem:[%s2589_s1 + $0x178] sm:$0xff]  ;;  %v2072_v35 = vld [vmem:[%s2588_s0 + $0x10] sm:$0xff]  ;;  %v45_v37 = vpack.c.bf16 %v2058_v31, %v2058_v31  ;;  %v1749_v38 = vld [vmem:[%s2589_s1 + $0xc0] sm:$0xff] }
  0x18   :  { %482 = vmatpush.bf16.msra.mxu2 %v1743_v22  ;;  %v1773_v39 = vld [vmem:[%s2589_s1 + $0x180] sm:$0xff]  ;;  %v2087_v40 = vld [vmem:[%s2588_s0 + $0x18] sm:$0xff]  ;;  %v1763_v41 = vld [vmem:[%s2589_s1 + $0x130] sm:$0xff]  ;;  %v46_v43 = vpack.c.bf16 %v2072_v35, %v2072_v35 }
  0x19   :  { %495 = vmatpush.bf16.msra.mxu3 %v1751_v23  ;;  %v1771_v42 = vld [vmem:[%s2589_s1 + $0x170] sm:$0xff]  ;;  %v47_v44 = vpack.c.bf16 %v2087_v40, %v2087_v40  ;;  %v1762_v45 = vld [vmem:[%s2589_s1 + $0x128] sm:$0xff]  ;;  %v1761_v47 = vld [vmem:[%s2589_s1 + $0x120] sm:$0xff] }
  0x1a   :  { %457 = vmatpush.bf16.msra.mxu0 %v1726_v24  ;;  %v1770_v46 = vld [vmem:[%s2589_s1 + $0x168] sm:$0xff]  ;;  %v1769_v48 = vld [vmem:[%s2589_s1 + $0x160] sm:$0xff]  ;;  %v1760_v49 = vld [vmem:[%s2589_s1 + $0x118] sm:$0xff] }
  0x1b   :  { %470 = vmatpush.bf16.msra.mxu1 %v1734_v25  ;;  %v1768_v50 = vld [vmem:[%s2589_s1 + $0x158] sm:$0xff]  ;;  %v2120_v51 = vld [vmem:[%s2588_s0 + $0x30] sm:$0xff]  ;;  %v1758_v55 = vld [vmem:[%s2589_s1 + $0x108] sm:$0xff] }
  0x1c   :  { %483 = vmatpush.bf16.msra.mxu2 %v1742_v26  ;;  %v1759_v52 = vld [vmem:[%s2589_s1 + $0x110] sm:$0xff]  ;;  %v50_v54 = vpack.c.bf16 %v2120_v51, %v2120_v51  ;;  %v1766_v56 = vld [vmem:[%s2589_s1 + $0x148] sm:$0xff]  ;;  %v1757_v57 = vld [vmem:[%s2589_s1 + $0x100] sm:$0xff] }
  0x1d   :  { %496 = vmatpush.bf16.msra.mxu3 %v1750_v28  ;;  %v1767_v53 = vld [vmem:[%s2589_s1 + $0x150] sm:$0xff]  ;;  %v1765_v58 = vld [vmem:[%s2589_s1 + $0x140] sm:$0xff]  ;;  %v2151_v60 = vld [vmem:[%s2588_s0 + $0x28] sm:$0xff]  ;;  %s1903_s1 = smov 96  }
  0x1e   :  { %458 = vmatpush.bf16.msra.mxu0 %v1725_v27  ;;  %v2146_v59 = vld [vmem:[%s2588_s0 + $0x20] sm:$0xff]  ;;  %v49_v62 = vpack.c.bf16 %v2151_v60, %v2151_v60  ;;  %v1781_v63 = vld [vmem:[%s2591_s3 + $0x38] sm:$0xff]  ;;  %v1780_v0 = vld [vmem:[%s2591_s3 + $0x30] sm:$0xff] }
  0x1f   :  { %471 = vmatpush.bf16.msra.mxu1 %v1733_v29  ;;  %v48_v61 = vpack.c.bf16 %v2146_v59, %v2146_v59  ;;  %v1779_v1 = vld [vmem:[%s2591_s3 + $0x28] sm:$0xff]  ;;  %v1778_v2 = vld [vmem:[%s2591_s3 + $0x20] sm:$0xff]  ;;  %v1777_v3 = vld [vmem:[%s2591_s3 + $0x18] sm:$0xff] }
  0x20   :  { %484 = vmatpush.bf16.msra.mxu2 %v1741_v34  ;;  %v1776_v4 = vld [vmem:[%s2591_s3 + $0x10] sm:$0xff]  ;;  %v1775_v7 = vld [vmem:[%s2591_s3 + $0x8] sm:$0xff]  ;;  %v1774_v8 = vld [vmem:[%s2591_s3] sm:$0xff] }
  0x21   :  { %459 = vmatmul.bf16.vlgmr.msra.gmra.mxu0 %v44_v36  ;;  %497 = vmatpush.bf16.msra.mxu3 %v1749_v38  ;;  %v630_v12 = vld [vmem:[%s2593_s5] sm:$0xff]  ;;  %v1783_v36 = vld [vmem:[%s2594_s6 + $0x8] sm:$0xff] }
  0x22   :  { %503 = vmatpush.bf16.msrb.mxu0 %v1764_v32  ;;  %472 = vmatmul.bf16.vlgmr.msra.gmra.mxu1 %v45_v37  ;;  %v1843_v14 = vld [vmem:[%s2590_s2] ss:$0 sm:$0xff] }
  0x23   :  { %516 = vmatpush.bf16.msrb.mxu1 %v1772_v33  ;;  %485 = vmatmul.bf16.vlgmr.msra.gmra.mxu2 %v46_v43  ;;  %v1844_v37 = vld [vmem:[%s2592_s4] ss:$0 sm:$0xff] }
  0x24   :  { %536 = vmatpush.bf16.msrb.mxu2 %v1773_v39  ;;  %498 = vmatmul.bf16.vlgmr.msra.gmra.mxu3 %v47_v44 }
  0x25   :  { %614 = vmatpush.bf16.msrb.mxu3 %v1781_v63  ;;  %632 = vrot.lane.b32.xlu0 %v630_v12, %s1902_s21  ;;  %v1826_v63 = vld [vmem:[%s2596_s8 + $0x154] sm:$0xf] }
  0x26   :  { %504 = vmatpush.bf16.msrb.mxu0 %v1763_v41 }
  0x27   :  { %517 = vmatpush.bf16.msrb.mxu1 %v1771_v42 }
  0x28   :  { %672 = vmatpush.bf16.msra.mxu2 %v1783_v36  ;;  %v1709_v36 = vld [vmem:[%s2596_s8 + $0x1ac] sm:$0xf0] }
  0x29   :  { %615 = vmatpush.bf16.msrb.mxu3 %v1780_v0 }
  0x2a   :  { %505 = vmatpush.bf16.msrb.mxu0 %v1762_v45 }
  0x2b   :  { %518 = vmatpush.bf16.msrb.mxu1 %v1770_v46 }
  0x2d   :  { %616 = vmatpush.bf16.msrb.mxu3 %v1779_v1  ;;  %v1673_v1 = vld [vmem:[%s2596_s8 + $0x16c] sm:$0xf0] }
  0x2e   :  { %506 = vmatpush.bf16.msrb.mxu0 %v1761_v47 }
  0x2f   :  { %519 = vmatpush.bf16.msrb.mxu1 %v1769_v48  ;;  %v1782_v48 = vld [vmem:[%s2594_s6] sm:$0xff] }
  0x30   :  { %673 = vmatpush.bf16.msra.mxu2 %v1782_v48 }
  0x31   :  { %617 = vmatpush.bf16.msrb.mxu3 %v1778_v2  ;;  %v1679_v2 = vld [vmem:[%s2596_s8 + $0x158] sm:$0xf] }
  0x32   :  { %507 = vmatpush.bf16.msrb.mxu0 %v1760_v49  ;;  %v1699_v49 = vld [vmem:[%s2596_s8 + $0x188] sm:$0xf] }
  0x33   :  { %520 = vmatpush.bf16.msrb.mxu1 %v1768_v50  ;;  %1459 = vmatmul.msk.bf16.vlgmr.msrb.gmra.mxu2 %vm447_vm0, %v50_v54  ;;  %v1836_v50 = vld [vmem:[%s2596_s8 + $0x1a0] sm:$0xf0]  ;;  %v1701_v54 = vld [vmem:[%s2596_s8 + $0x1a4] sm:$0xf0] }
  0x35   :  { %618 = vmatpush.bf16.msrb.mxu3 %v1777_v3  ;;  %v1830_v3 = vld [vmem:[%s2596_s8 + $0x170] sm:$0xf0] }
  0x36   :  { %508 = vmatpush.bf16.msrb.mxu0 %v1759_v52  ;;  %v1833_v52 = vld [vmem:[%s2596_s8 + $0x18c] sm:$0xf] }
  0x37   :  { %521 = vmatpush.bf16.msrb.mxu1 %v1767_v53  ;;  %v1700_v53 = vor.u32 %v1836_v50, %v1699_v49  ;;  %v1681_v49 = vld [vmem:[%s2596_s8 + $0x174] sm:$0xf0]  ;;  %v1559_v50 = vld [vmem:[%s2596_s8 + $0x70] sm:$0xf] }
  0x39   :  { %619 = vmatpush.bf16.msrb.mxu3 %v1776_v4  ;;  %v1676_v4 = vor.u32 %v1826_v63, %v1673_v1  ;;  %v1531_v1 = vld [vmem:[%s2596_s8 + $0x38] sm:$0xf] }
  0x3a   :  { %509 = vmatpush.bf16.msrb.mxu0 %v1758_v55  ;;  %v1707_v55 = vld [vmem:[%s2596_s8 + $0x190] sm:$0xf] }
  0x3b   :  { %522 = vmatpush.bf16.msrb.mxu1 %v1766_v56  ;;  %v1837_v56 = vld [vmem:[%s2596_s8 + $0x1a8] sm:$0xf0] }
  0x3d   :  { %620 = vmatpush.bf16.msrb.mxu3 %v1775_v7  ;;  %v1822_v7 = vld [vmem:[%s2596_s8 + $0x130] sm:$0xf0] }
  0x3e   :  { %510 = vmatpush.bf16.msrb.mxu0 %v1757_v57  ;;  %v1704_v57 = vor.u32 %v1833_v52, %v1701_v54  ;;  %v1801_v52 = vld [vmem:[%s2596_s8 + $0x88] sm:$0xf0]  ;;  %v1798_v54 = vld [vmem:[%s2596_s8 + $0x74] sm:$0xf] }
  0x3f   :  { %523 = vmatpush.bf16.msrb.mxu1 %v1765_v58  ;;  %v1708_v58 = vor.u32 %v1837_v56, %v1707_v55  ;;  %v1561_v55 = vld [vmem:[%s2596_s8 + $0x8c] sm:$0xf0]  ;;  %v1567_v56 = vld [vmem:[%s2596_s8 + $0x78] sm:$0xf] }
  0x40   :  { %v1564_v63 = vor.u32 %v1798_v54, %v1561_v55  ;;  %v1659_v54 = vld [vmem:[%s2596_s8 + $0x128] sm:$0xf] }
  0x41   :  { %511 = vmatmul.bf16.vlgmr.msrb.gmra.mxu0 %v48_v61  ;;  %621 = vmatpush.bf16.msrb.mxu3 %v1774_v8  ;;  %v1671_v61 = vld [vmem:[%s2596_s8 + $0x150] sm:$0xf]  ;;  %v1819_v8 = vld [vmem:[%s2596_s8 + $0x11c] sm:$0xf] }
  0x42   :  { %524 = vmatmul.bf16.vlgmr.msrb.gmra.mxu1 %v49_v62  ;;  %v1829_v62 = vld [vmem:[%s2596_s8 + $0x168] sm:$0xf0]  ;;  %1051 = vmatpush.bf16.msra.mxu0 %v1700_v53 }
  0x43   :  { %v1672_v0 = vor.u32 %v1829_v62, %v1671_v61  ;;  %1064 = vmatpush.bf16.msra.mxu1 %v1704_v57  ;;  %1077 = vmatpush.bf16.msrb.mxu2 %v1708_v58  ;;  %v1560_v57 = vor.u32 %v1801_v52, %v1559_v50  ;;  %v1802_v58 = vld [vmem:[%s2596_s8 + $0x90] sm:$0xf0]  ;;  %v1820_v61 = vld [vmem:[%s2596_s8 + $0x124] sm:$0xf]  ;;  %v1653_v62 = vld [vmem:[%s2596_s8 + $0x13c] sm:$0xf0] }
  0x44   :  { %v1792_v52 = vld [vmem:[%s2596_s8 + $0x44] sm:$0xf] }
  0x46   :  { %1052 = vmatpush.bf16.msra.mxu0 %v1672_v0  ;;  %v1568_v0 = vor.u32 %v1802_v58, %v1567_v56  ;;  %v1824_v56 = vld [vmem:[%s2596_s8 + $0x140] sm:$0xf0]  ;;  %v1661_v58 = vld [vmem:[%s2596_s8 + $0x144] sm:$0xf0] }
  0x47   :  { %1065 = vmatpush.bf16.msra.mxu1 %v1676_v4  ;;  %v1656_v4 = vor.u32 %v1820_v61, %v1653_v62  ;;  %v1660_v61 = vor.u32 %v1824_v56, %v1659_v54 }
  0x97   :  { %v633_v45 = vpop.permute.xlu0 %632 }
  0x9e   :  { %v460_v5 = vpop.f32.mrf.mxu0 }
  0x9f   :  { %v473_v6 = vpop.f32.mrf.mxu1  ;;  %v461_v15 = vadd.f32 %v1843_v14, %v460_v5  ;;  %v1680_v5 = vor.u32 %v1830_v3, %v1679_v2  ;;  %v1794_v2 = vld [vmem:[%s2596_s8 + $0x50] sm:$0xf0]  ;;  %v1791_v3 = vld [vmem:[%s2596_s8 + $0x3c] sm:$0xf] }
  0xa1   :  { %v474_v18 = vadd.f32 %v473_v6, %v461_v15  ;;  %v1643_v6 = vld [vmem:[%s2596_s8 + $0x118] sm:$0xf]  ;;  %1078 = vmatpush.bf16.msrb.mxu2 %v1680_v5 }
  0xa2   :  { %v1644_v12 = vor.u32 %v1822_v7, %v1643_v6  ;;  %v1533_v5 = vld [vmem:[%s2596_s8 + $0x54] sm:$0xf0]  ;;  %v1539_v6 = vld [vmem:[%s2596_s8 + $0x40] sm:$0xf]  ;;  %v1795_v7 = vld [vmem:[%s2596_s8 + $0x58] sm:$0xf0] }
  0xa4   :  { %1053 = vmatpush.bf16.msra.mxu0 %v1644_v12  ;;  %v1787_v12 = vld [vmem:[%s2596_s8 + $0x18] sm:$0xf0] }
  0xa6   :  { %v462_v9 = vpop.f32.mrf.mxu0  ;;  %v486_v11 = vpop.f32.mrf.mxu2 }
  0xa7   :  { %v475_v10 = vpop.f32.mrf.mxu1  ;;  %v499_v13 = vpop.f32.mrf.mxu3  ;;  %v487_v19 = vadd.f32 %v486_v11, %v474_v18  ;;  %v1645_v9 = vld [vmem:[%s2596_s8 + $0x134] sm:$0xf0]  ;;  %v1823_v11 = vld [vmem:[%s2596_s8 + $0x138] sm:$0xf0] }
  0xa8   :  { %v1651_v10 = vld [vmem:[%s2596_s8 + $0x120] sm:$0xf] }
  0xa9   :  { %v500_v21 = vadd.f32 %v499_v13, %v487_v19  ;;  %v1648_v13 = vor.u32 %v1819_v8, %v1645_v9  ;;  %v1652_v14 = vor.u32 %v1823_v11, %v1651_v10  ;;  %v1813_v8 = vld [vmem:[%s2596_s8 + $0xec] sm:$0xf]  ;;  %v1625_v9 = vld [vmem:[%s2596_s8 + $0x104] sm:$0xf0]  ;;  %v1532_v10 = vor.u32 %v1794_v2, %v1531_v1  ;;  %v1503_v11 = vld [vmem:[%s2596_s8] sm:$0xf] }
  0xaa   :  { %v1785_v2 = vld [vmem:[%s2596_s8 + $0xc] sm:$0xf] }
  0xab   :  { %1066 = vmatpush.bf16.msra.mxu1 %v1648_v13  ;;  %1079 = vmatpush.bf16.msrb.mxu2 %v1652_v14  ;;  %v1536_v13 = vor.u32 %v1791_v3, %v1533_v5  ;;  %v1540_v14 = vor.u32 %v1795_v7, %v1539_v6  ;;  %v1513_v3 = vld [vmem:[%s2596_s8 + $0x24] sm:$0xf0]  ;;  %v1817_v6 = vld [vmem:[%s2596_s8 + $0x108] sm:$0xf0]  ;;  %v1814_v7 = vld [vmem:[%s2596_s8 + $0xf4] sm:$0xf] }
  0xac   :  { %v1516_v5 = vor.u32 %v1785_v2, %v1513_v3  ;;  %v747_v2 = vld [vmem:[%s2597_s9] sm:$0x7f] }
  0xad   :  { %v749_v3 = vperm.slane %v747_v2, 0 }
  0xae   :  { %v488_v16 = vpop.f32.mrf.mxu2 }
  0xaf   :  { %v501_v17 = vpop.f32.mrf.mxu3 }
  0xb6   :  { %v538_v20 = vpop.f32.mrf.mxu2 }
  0xbe   :  { %v512_v22 = vpop.f32.mrf.mxu0  ;;  %v540_v26 = vpop.f32.mrf.mxu2 }
  0xbf   :  { %v525_v23 = vpop.f32.mrf.mxu1  ;;  %v513_v24 = vadd.f32 %v512_v22, %v500_v21 }
  0xc1   :  { %v526_v25 = vadd.f32 %v525_v23, %v513_v24  ;;  %v1615_v23 = vld [vmem:[%s2596_s8 + $0xe0] sm:$0xf]  ;;  %v1815_v24 = vld [vmem:[%s2596_s8 + $0xf8] sm:$0xf0] }
  0xc2   :  { %v1616_v26 = vor.u32 %v1815_v24, %v1615_v23  ;;  %v1838_v23 = vld [vmem:[%s2596_s8 + $0x1b0] sm:$0xf0]  ;;  %v1835_v24 = vld [vmem:[%s2596_s8 + $0x19c] sm:$0xf] }
  0xc3   :  { %v539_v27 = vadd.f32 %v538_v20, %v526_v25  ;;  %v1812_v25 = vld [vmem:[%s2596_s8 + $0xe4] sm:$0xf] }
  0xc4   :  { %1054 = vmatpush.bf16.msra.mxu0 %v1616_v26  ;;  %v1717_v26 = vld [vmem:[%s2596_s8 + $0x1b4] sm:$0xf0] }
  0xc5   :  { %v543_v28 = vmul.f32 0.2, %v539_v27  ;;  %vm542_vm1 = vcmp.gt.f32.partialorder %v539_v27, 0.0 }
  0xc6   :  { %v514_v29 = vpop.f32.mrf.mxu0 }
  0xc7   :  { %v527_v32 = vpop.f32.mrf.mxu1  ;;  %v544_v33 = vsel %vm542_vm1, %v539_v27, %v543_v28  ;;  %v1617_v27 = vld [vmem:[%s2596_s8 + $0xfc] sm:$0xf0]  ;;  %v1623_v28 = vld [vmem:[%s2596_s8 + $0xe8] sm:$0xf]  ;;  %v1816_v29 = vld [vmem:[%s2596_s8 + $0x100] sm:$0xf0] }
  0xc8   :  { %v545_v34 = vpack.c.bf16 %v544_v33, %v544_v33  ;;  %v1620_v32 = vor.u32 %v1812_v25, %v1617_v27  ;;  %v1624_v33 = vor.u32 %v1816_v29, %v1623_v28  ;;  %v1504_v25 = vor.u32 %v1787_v12, %v1503_v11  ;;  %v1723_v27 = vld [vmem:[%s2596_s8 + $0x1a0] sm:$0xf]  ;;  %v1839_v28 = vld [vmem:[%s2596_s8 + $0x1b8] sm:$0xf0]  ;;  %v1639_v12 = vld [vmem:[%s2596_s8 + $0xf8] sm:$0xf] }
  0xca   :  { %622 = vmatmul.bf16.vlgmr.msrb.gmra.mxu3 %v545_v34  ;;  %v1834_v34 = vld [vmem:[%s2596_s8 + $0x194] sm:$0xf]  ;;  %1067 = vmatpush.bf16.msra.mxu1 %v1620_v32 }
  0xcb   :  { %1080 = vmatpush.bf16.msrb.mxu2 %v1624_v33 }
 0x14d   :  { %v623_v38 = vpop.f32.mrf.mxu3 }
 0x14e   :  { %v624_v39 = vadd.f32 %v1844_v37, %v623_v38  ;;  %v1587_v37 = vld [vmem:[%s2596_s8 + $0xa8] sm:$0xf]  ;;  %v1712_v38 = vor.u32 %v1834_v34, %v1709_v36  ;;  %v1799_v36 = vld [vmem:[%s2596_s8 + $0x7c] sm:$0xf] }
 0x150   :  { %v1229_v41 = vmul.f32 %v624_v39, %v624_v39  ;;  %v627_v42 = vmul.f32 0.5, %v624_v39  ;;  %v1228_v15 = vadd.f32 1.0, %v624_v39  ;;  %1090 = vmatpush.bf16.msra.mxu3 %v1712_v38  ;;  %v1720_v38 = vor.u32 %v1835_v24, %v1717_v26  ;;  %v1803_v26 = vld [vmem:[%s2596_s8 + $0x98] sm:$0xf0] }
 0x152   :  { %1231 = vrot.lane.b32.xlu1 %v1229_v41, %s1902_s21  ;;  %v628_v43 = vmul.f32 1.442695, %v627_v42  ;;  %v1805_v41 = vld [vmem:[%s2596_s8 + $0xac] sm:$0xf]  ;;  %v1589_v42 = vld [vmem:[%s2596_s8 + $0xc4] sm:$0xf0] }
 0x154   :  { %1846 = vpow2.f32 %v628_v43 }
 0x155   :  { %v625_v44 = vpop.f32.mrf.mxu3 }
 0x156   :  { %v1592_v44 = vor.u32 %v1805_v41, %v1589_v42  ;;  %v1687_v41 = vld [vmem:[%s2596_s8 + $0x160] sm:$0xf]  ;;  %v1831_v42 = vld [vmem:[%s2596_s8 + $0x178] sm:$0xf0] }
 0x158   :  { %1068 = vmatpush.bf16.msra.mxu1 %v1592_v44  ;;  %v1689_v44 = vld [vmem:[%s2596_s8 + $0x17c] sm:$0xf0] }
 0x15a   :  { %v1847_v46 = vpop.eup %1846 }
 0x15b   :  { %v635_v47 = vmul.f32 %v1847_v46, %v633_v45  ;;  %v1235_v18 = vmul.f32 %v1847_v46, %v1847_v46  ;;  %v1595_v45 = vld [vmem:[%s2596_s8 + $0xb0] sm:$0xf]  ;;  %v1809_v46 = vld [vmem:[%s2596_s8 + $0xc8] sm:$0xf0] }
 0x15c   :  { %v1596_v48 = vor.u32 %v1809_v46, %v1595_v45  ;;  %1069 = vmatpush.bf16.msra.mxu1 %v1564_v63  ;;  %v1695_v45 = vld [vmem:[%s2596_s8 + $0x168] sm:$0xf]  ;;  %v1832_v46 = vld [vmem:[%s2596_s8 + $0x180] sm:$0xf0]  ;;  %v1667_v63 = vld [vmem:[%s2596_s8 + $0x130] sm:$0xf] }
 0x15d   :  { %637 = vrot.lane.b32.xlu0 %v635_v47, %s1903_s1  ;;  %v1827_v47 = vld [vmem:[%s2596_s8 + $0x15c] sm:$0xf]  ;;  %v1696_v50 = vor.u32 %v1832_v46, %v1695_v45  ;;  %v1519_v46 = vld [vmem:[%s2596_s8 + $0x10] sm:$0xf] }
 0x15e   :  { %v1684_v53 = vor.u32 %v1827_v47, %v1681_v49  ;;  %1081 = vmatpush.bf16.msrb.mxu2 %v1596_v48  ;;  %v1688_v48 = vor.u32 %v1831_v42, %v1687_v41  ;;  %v1549_v41 = vld [vmem:[%s2596_s8 + $0x64] sm:$0xf0]  ;;  %v1555_v42 = vld [vmem:[%s2596_s8 + $0x50] sm:$0xf] }
 0x160   :  { %1091 = vmatpush.bf16.msra.mxu3 %v1684_v53  ;;  %1070 = vmatpush.bf16.msra.mxu1 %v1536_v13  ;;  %v1541_v53 = vld [vmem:[%s2596_s8 + $0x5c] sm:$0xf0]  ;;  %v1818_v13 = vld [vmem:[%s2596_s8 + $0x110] sm:$0xf0] }
 0x161   :  { %v1544_v55 = vor.u32 %v1792_v52, %v1541_v53  ;;  %v1527_v52 = vld [vmem:[%s2596_s8 + $0x18] sm:$0xf]  ;;  %v1790_v53 = vld [vmem:[%s2596_s8 + $0x30] sm:$0xf0] }
 0x162   :  { %1082 = vmatpush.bf16.msrb.mxu2 %v1568_v0  ;;  %v1825_v0 = vld [vmem:[%s2596_s8 + $0x148] sm:$0xf0]  ;;  %v1528_v56 = vor.u32 %v1790_v53, %v1527_v52 }
 0x163   :  { %v1668_v1 = vor.u32 %v1825_v0, %v1667_v63 }
 0x164   :  { %1092 = vmatpush.bf16.msra.mxu3 %v1656_v4  ;;  %v1631_v4 = vld [vmem:[%s2596_s8 + $0xf0] sm:$0xf] }
 0x166   :  { %1083 = vmatpush.bf16.msrb.mxu2 %v1540_v14 }
 0x1c4   :  { %v1232_v16 = vpop.permute.xlu1 %1231 }
 0x1c5   :  { %v1234_v17 = vsub.f32 %v1228_v15, %v1232_v16  ;;  %v1784_v15 = vld [vmem:[%s2596_s8 + $0x4] sm:$0xf]  ;;  %v1505_v16 = vld [vmem:[%s2596_s8 + $0x1c] sm:$0xf0] }
 0x1c6   :  { %v1508_v29 = vor.u32 %v1784_v15, %v1505_v16  ;;  %v1640_v15 = vor.u32 %v1818_v13, %v1639_v12  ;;  %v1603_v16 = vld [vmem:[%s2596_s8 + $0xb8] sm:$0xf]  ;;  %v752_v12 = vperm.slane %v747_v2, 3 }
 0x1c7   :  { %v1236_v19 = vsub.f32 %v1234_v17, %v1235_v18  ;;  %v1511_v17 = vld [vmem:[%s2596_s8 + $0x8] sm:$0xf]  ;;  %v1628_v18 = vor.u32 %v1813_v8, %v1625_v9  ;;  %v1633_v8 = vld [vmem:[%s2596_s8 + $0x10c] sm:$0xf0] }
 0x1c8   :  { %1071 = vmatpush.bf16.msra.mxu1 %v1508_v29  ;;  %v1636_v11 = vor.u32 %v1814_v7, %v1633_v8  ;;  %v1583_v29 = vld [vmem:[%s2596_s8 + $0x88] sm:$0xf] }
 0x1c9   :  { %1238 = vrot.lane.b32.xlu1 %v1236_v19, %s1903_s1  ;;  %v1788_v19 = vld [vmem:[%s2596_s8 + $0x20] sm:$0xf0]  ;;  %1093 = vmatpush.bf16.msra.mxu3 %v1628_v18  ;;  %v1807_v18 = vld [vmem:[%s2596_s8 + $0xbc] sm:$0xf] }
 0x1ca   :  { %v1512_v32 = vor.u32 %v1788_v19, %v1511_v17  ;;  %v1810_v17 = vld [vmem:[%s2596_s8 + $0xd0] sm:$0xf0] }
 0x1cb   :  { %v1604_v19 = vor.u32 %v1810_v17, %v1603_v16 }
 0x1cc   :  { %1084 = vmatpush.bf16.msrb.mxu2 %v1512_v32  ;;  %1116 = vmatpush.bf16.msrb.mxu1 %v1720_v38  ;;  %v1804_v32 = vld [vmem:[%s2596_s8 + $0xa0] sm:$0xf0] }
 0x1cd   :  { %v1796_v38 = vld [vmem:[%s2596_s8 + $0x60] sm:$0xf0] }
 0x1cf   :  { %v638_v20 = vpop.permute.xlu0 %637 }
 0x1d0   :  { %v640_v21 = vadd.f32 %v638_v20, %v624_v39  ;;  %v1808_v39 = vld [vmem:[%s2596_s8 + $0xc0] sm:$0xf0]  ;;  %v1806_v20 = vld [vmem:[%s2596_s8 + $0xb4] sm:$0xf] }
 0x1d1   :  { %v1588_v43 = vor.u32 %v1808_v39, %v1587_v37  ;;  %v1569_v37 = vld [vmem:[%s2596_s8 + $0x94] sm:$0xf0]  ;;  %v1724_v39 = vor.u32 %v1839_v28, %v1723_v27  ;;  %v1800_v27 = vld [vmem:[%s2596_s8 + $0x84] sm:$0xf]  ;;  %v1577_v28 = vld [vmem:[%s2596_s8 + $0x9c] sm:$0xf0] }
 0x1d2   :  { %v641_v22 = vpack.c.bf16 %v640_v21, %v640_v21  ;;  %v1597_v21 = vld [vmem:[%s2596_s8 + $0xcc] sm:$0xf0]  ;;  %v1572_v47 = vor.u32 %v1799_v36, %v1569_v37  ;;  %v1547_v36 = vld [vmem:[%s2596_s8 + $0x48] sm:$0xf]  ;;  %v1584_v37 = vor.u32 %v1804_v32, %v1583_v29 }
 0x1d3   :  { %1055 = vmatpush.bf16.msra.mxu0 %v1588_v43  ;;  %v1600_v33 = vor.u32 %v1806_v20, %v1597_v21  ;;  %v1828_v43 = vld [vmem:[%s2596_s8 + $0x164] sm:$0xf]  ;;  %v1605_v20 = vld [vmem:[%s2596_s8 + $0xd4] sm:$0xf0]  ;;  %v1611_v21 = vld [vmem:[%s2596_s8 + $0xc0] sm:$0xf] }
 0x1d4   :  { %1500 = vmatmul.msk.bf16.vlgmr.msra.gmra.mxu2 %vm662_vm2, %v641_v22  ;;  %v1715_v22 = vld [vmem:[%s2596_s8 + $0x198] sm:$0xf]  ;;  %v1692_v49 = vor.u32 %v1828_v43, %v1689_v44  ;;  %v1797_v43 = vld [vmem:[%s2596_s8 + $0x68] sm:$0xf0]  ;;  %v1548_v44 = vor.u32 %v1796_v38, %v1547_v36 }
 0x1d5   :  { %v1716_v34 = vor.u32 %v1838_v23, %v1715_v22  ;;  %1094 = vmatpush.bf16.msra.mxu3 %v1600_v33  ;;  %1129 = vmatpush.bf16.msra.mxu2 %v1724_v39  ;;  %v1811_v22 = vld [vmem:[%s2596_s8 + $0xd8] sm:$0xf0]  ;;  %v1608_v23 = vor.u32 %v1807_v18, %v1605_v20  ;;  %v1793_v39 = vld [vmem:[%s2596_s8 + $0x4c] sm:$0xf] }
 0x1d6   :  { %1117 = vmatpush.bf16.msrb.mxu1 %v1692_v49  ;;  %v1612_v24 = vor.u32 %v1811_v22, %v1611_v21  ;;  %v1552_v45 = vor.u32 %v1793_v39, %v1549_v41  ;;  %v1786_v49 = vld [vmem:[%s2596_s8 + $0x14] sm:$0xf] }
 0x1d7   :  { %1056 = vmatpush.bf16.msra.mxu0 %v1560_v57  ;;  %v1821_v57 = vld [vmem:[%s2596_s8 + $0x12c] sm:$0xf] }
 0x1d8   :  { %v1664_v62 = vor.u32 %v1821_v57, %v1661_v58  ;;  %v1845_v57 = vld [vmem:[%s2595_s7] ss:$0 sm:$0xff]  ;;  %s1904_s7 = smov [#allocation2]  }
 0x1d9   :  { %1095 = vmatpush.bf16.msra.mxu3 %v1572_v47  ;;  %1130 = vmatpush.bf16.msra.mxu2 %v1696_v50  ;;  %v1556_v47 = vor.u32 %v1797_v43, %v1555_v42  ;;  %v1521_v50 = vld [vmem:[%s2596_s8 + $0x2c] sm:$0xf0]  ;;  %s1252_s9 = sshll.u32 %s1904_s7, 4  ;;  %s1253_s9 = int_to_ptr.vmem [resolvable:$true] %s1252_s9 }
 0x1da   :  { %1118 = vmatpush.bf16.msrb.mxu1 %v1664_v62 }
 0x1db   :  { %1057 = vmatpush.bf16.msra.mxu0 %v1532_v10  ;;  %v1632_v10 = vor.u32 %v1817_v6, %v1631_v4  ;;  %v750_v4 = vperm.slane %v747_v2, 1 }
 0x1dd   :  { %1096 = vmatpush.bf16.msra.mxu3 %v1544_v55  ;;  %1131 = vmatpush.bf16.msra.mxu2 %v1668_v1  ;;  %v1524_v55 = vor.u32 %v1786_v49, %v1521_v50 }
 0x1de   :  { %1119 = vmatpush.bf16.msrb.mxu1 %v1636_v11  ;;  %v751_v11 = vperm.slane %v747_v2, 2 }
 0x1df   :  { %1058 = vmatpush.bf16.msra.mxu0 %v1504_v25  ;;  %v1575_v25 = vld [vmem:[%s2596_s8 + $0x80] sm:$0xf] }
 0x1e0   :  { %v1576_v33 = vor.u32 %v1803_v26, %v1575_v25 }
 0x1e1   :  { %1097 = vmatpush.bf16.msra.mxu3 %v1516_v5  ;;  %1132 = vmatpush.bf16.msra.mxu2 %v1640_v15 }
 0x1e2   :  { %1120 = vmatpush.bf16.msrb.mxu1 %v1608_v23 }
 0x1e3   :  { %1103 = vmatpush.bf16.msrb.mxu0 %v1716_v34  ;;  %v1580_v34 = vor.u32 %v1800_v27, %v1577_v28  ;;  %v753_v27 = vperm.slane %v747_v2, 4  ;;  %v754_v28 = vperm.slane %v747_v2, 5 }
 0x1e5   :  { %1133 = vmatpush.bf16.msra.mxu2 %v1612_v24 }
 0x1e6   :  { %1121 = vmatpush.bf16.msrb.mxu1 %v1580_v34 }
 0x1e7   :  { %1104 = vmatpush.bf16.msrb.mxu0 %v1688_v48  ;;  %v1789_v48 = vld [vmem:[%s2596_s8 + $0x28] sm:$0xf0] }
 0x1e8   :  { %v1520_v54 = vor.u32 %v1789_v48, %v1519_v46 }
 0x1e9   :  { %1134 = vmatpush.bf16.msra.mxu2 %v1584_v37 }
 0x1ea   :  { %1122 = vmatpush.bf16.msrb.mxu1 %v1552_v45 }
 0x1eb   :  { %1105 = vmatpush.bf16.msrb.mxu0 %v1660_v61 }
 0x1ed   :  { %1135 = vmatpush.bf16.msra.mxu2 %v1556_v47  ;;  %v755_v47 = vperm.slane %v747_v2, 6 }
 0x1ee   :  { %1123 = vmatpush.bf16.msrb.mxu1 %v1524_v55 }
 0x1ef   :  { %1106 = vmatpush.bf16.msrb.mxu0 %v1632_v10 }
 0x1f1   :  { %1136 = vmatpush.bf16.msra.mxu2 %v1528_v56 }
 0x1f3   :  { %1107 = vmatpush.bf16.msrb.mxu0 %v1604_v19 }
 0x1f7   :  { %1108 = vmatpush.bf16.msrb.mxu0 %v1576_v33 }
 0x1fb   :  { %1109 = vmatpush.bf16.msrb.mxu0 %v1548_v44 }
 0x1ff   :  { %1110 = vmatpush.bf16.msrb.mxu0 %v1520_v54 }
 0x23b   :  { %v1239_v9 = vpop.permute.xlu1 %1238 }
 0x23c   :  { %v1241_v14 = vsel %vm662_vm2, %v1239_v9, 0.0 }
 0x23d   :  { %1242 = vadd.xlane.f32.xlu2 %v1241_v14 }
 0x257   :  { %v675_v58 = vpop.f32.mrf.mxu2 }
 0x258   :  { %v676_v61 = vadd.f32 %v1845_v57, %v675_v58 }
 0x25a   :  { %vm679_vm3 = vcmp.gt.f32.partialorder %v676_v61, 0.0  ;;  %v680_v62 = vmul.f32 0.2, %v676_v61 }
 0x25c   :  { %v681_v63 = vsel %vm679_vm3, %v676_v61, %v680_v62 }
 0x25d   :  { %v682_v0 = vpack.c.bf16 %v681_v63, %v681_v63 }
 0x25f   :  { %v677_v1 = vpop.f32.mrf.mxu2  ;;  %1059 = vmatmul.bf16.vlgmr.msra.gmra.mxu0 %v682_v0  ;;  %1072 = vmatmul.bf16.vlgmr.msra.gmra.mxu1 %v682_v0 }
 0x260   :  { %1085 = vmatmul.bf16.vlgmr.msrb.gmra.mxu2 %v682_v0  ;;  %1098 = vmatmul.bf16.vlgmr.msra.gmra.mxu3 %v682_v0 }
 0x26f   :  { %1111 = vmatmul.bf16.vlgmr.msrb.gmra.mxu0 %v682_v0  ;;  %1124 = vmatmul.bf16.vlgmr.msrb.gmra.mxu1 %v682_v0 }
 0x270   :  { %1137 = vmatmul.bf16.vlgmr.msra.gmra.mxu2 %v682_v0 }
 0x2dc   :  { %v1060_v5 = vpop.f32.mrf.mxu0  ;;  %v1073_v6 = vpop.f32.mrf.mxu1 }
 0x2dd   :  { %v2542_v7 = vadd.f32 %v1060_v5, %v749_v3  ;;  %v2544_v8 = vadd.f32 %v1073_v6, %v750_v4 }
 0x2df   :  { %v1149_v9 = vand.u32 2147483647, %v2542_v7  ;;  %v1150_v10 = vand.u32 2147483647, %v2544_v8 }
 0x2e1   :  { %v1156_v13 = vsub.f32 0.0, %v1149_v9  ;;  %v1157_v14 = vsub.f32 0.0, %v1150_v10  ;;  %v1142_v9 = vmax.f32 %v2542_v7, 0.0  ;;  %v1143_v10 = vmax.f32 %v2544_v8, 0.0 }
 0x2e3   :  { %v1163_v15 = vmul.f32 1.442695, %v1156_v13  ;;  %v1086_v16 = vpop.f32.mrf.mxu2  ;;  %v1099_v17 = vpop.f32.mrf.mxu3  ;;  %v1165_v18 = vmul.f32 1.442695, %v1157_v14 }
 0x2e4   :  { %v2548_v19 = vadd.f32 %v1086_v16, %v751_v11  ;;  %v2550_v20 = vadd.f32 %v1099_v17, %v752_v12  ;;  %v1062_v21 = vpop.f32.mrf.mxu0  ;;  %v1075_v22 = vpop.f32.mrf.mxu1 }
 0x2e5   :  { %1848 = vpow2.f32 %v1163_v15  ;;  %v1205_v22 = vmul.f32 %v2542_v7, %v2053_v30 }
 0x2e6   :  { %1850 = vpow2.f32 %v1165_v18  ;;  %v1151_v23 = vand.u32 2147483647, %v2548_v19  ;;  %v1152_v24 = vand.u32 2147483647, %v2550_v20  ;;  %v1144_v17 = vmax.f32 %v2548_v19, 0.0 }
 0x2e8   :  { %v1158_v25 = vsub.f32 0.0, %v1151_v23  ;;  %v1159_v26 = vsub.f32 0.0, %v1152_v24  ;;  %v1206_v23 = vmul.f32 %v2544_v8, %v2058_v31 }
 0x2ea   :  { %v1167_v29 = vmul.f32 1.442695, %v1158_v25  ;;  %v1169_v33 = vmul.f32 1.442695, %v1159_v26  ;;  %v1207_v26 = vmul.f32 %v2548_v19, %v2072_v35 }
 0x2eb   :  { %v1849_v32 = vpop.eup %1848  ;;  %v1088_v34 = vpop.f32.mrf.mxu2 }
 0x2ec   :  { %v1101_v36 = vpop.f32.mrf.mxu3  ;;  %v1851_v37 = vpop.eup %1850  ;;  %v1177_v38 = vadd.f32 1.0, %v1849_v32  ;;  %1852 = vpow2.f32 %v1167_v29  ;;  %v1145_v34 = vmax.f32 %v2550_v20, 0.0 }
 0x2ed   :  { %v1112_v39 = vpop.f32.mrf.mxu0  ;;  %v1125_v41 = vpop.f32.mrf.mxu1  ;;  %v1178_v42 = vadd.f32 1.0, %v1851_v37  ;;  %1854 = vpow2.f32 %v1169_v33 }
 0x2ee   :  { %v2554_v43 = vadd.f32 %v1112_v39, %v753_v27  ;;  %v2556_v44 = vadd.f32 %v1125_v41, %v754_v28  ;;  %1856 = vlog2.f32 %v1177_v38  ;;  %v1208_v38 = vmul.f32 %v2550_v20, %v2087_v40 }
 0x2ef   :  { %1858 = vlog2.f32 %v1178_v42 }
 0x2f0   :  { %v1153_v45 = vand.u32 2147483647, %v2554_v43  ;;  %v1154_v46 = vand.u32 2147483647, %v2556_v44  ;;  %v1146_v35 = vmax.f32 %v2554_v43, 0.0  ;;  %v1210_v40 = vmul.f32 %v2556_v44, %v2151_v60 }
 0x2f2   :  { %v1160_v48 = vsub.f32 0.0, %v1153_v45  ;;  %v1853_v49 = vpop.eup %1852  ;;  %v1161_v50 = vsub.f32 0.0, %v1154_v46  ;;  %v1209_v45 = vmul.f32 %v2554_v43, %v2146_v59  ;;  %v1147_v46 = vmax.f32 %v2556_v44, 0.0 }
 0x2f3   :  { %v1855_v52 = vpop.eup %1854  ;;  %v1179_v53 = vadd.f32 1.0, %v1853_v49  ;;  %v1138_v55 = vpop.f32.mrf.mxu2 }
 0x2f4   :  { %v1171_v54 = vmul.f32 1.442695, %v1160_v48  ;;  %v1180_v56 = vadd.f32 1.0, %v1855_v52  ;;  %v1173_v57 = vmul.f32 1.442695, %v1161_v50  ;;  %v2560_v58 = vadd.f32 %v1138_v55, %v755_v47  ;;  %v1857_v63 = vpop.eup %1856 }
 0x2f5   :  { %v1114_v61 = vpop.f32.mrf.mxu0  ;;  %v1127_v62 = vpop.f32.mrf.mxu1  ;;  %1860 = vlog2.f32 %v1179_v53  ;;  %v1185_v3 = vmul.f32 0.6931472, %v1857_v63 }
 0x2f6   :  { %v1859_v0 = vpop.eup %1858  ;;  %1862 = vlog2.f32 %v1180_v56  ;;  %v1155_v1 = vand.u32 2147483647, %v2560_v58  ;;  %v1148_v52 = vmax.f32 %v2560_v58, 0.0  ;;  %v1243_v62 = vpop.xlane.xlu2 %1242 }
 0x2f7   :  { %1864 = vpow2.f32 %v1171_v54  ;;  %v1187_v4 = vmul.f32 0.6931472, %v1859_v0  ;;  %v1198_v15 = vadd.f32 %v1185_v3, %v1142_v9  ;;  %v1211_v54 = vmul.f32 %v2560_v58, %v2120_v51 }
 0x2f8   :  { %1866 = vpow2.f32 %v1173_v57  ;;  %v1162_v2 = vsub.f32 0.0, %v1155_v1  ;;  %v1244_v60 = vmul.f32 -0.5, %v1243_v62 }
 0x2f9   :  { %v1199_v16 = vadd.f32 %v1187_v4, %v1143_v10  ;;  %v1212_v27 = vsub.f32 %v1198_v15, %v1205_v22 }
 0x2fa   :  { %v1175_v5 = vmul.f32 1.442695, %v1162_v2 }
 0x2fb   :  { %v1861_v6 = vpop.eup %1860  ;;  %v1140_v11 = vpop.f32.mrf.mxu2  ;;  %v1213_v28 = vsub.f32 %v1199_v16, %v1206_v23 }
 0x2fc   :  { %v1863_v12 = vpop.eup %1862  ;;  %v1189_v13 = vmul.f32 0.6931472, %v1861_v6  ;;  %1868 = vpow2.f32 %v1175_v5 }
 0x2fd   :  { %v1865_v14 = vpop.eup %1864  ;;  %v1191_v29 = vmul.f32 0.6931472, %v1863_v12  ;;  %v1219_v37 = vadd.f32 %v1213_v28, %v1212_v27 }
 0x2fe   :  { %v1867_v18 = vpop.eup %1866  ;;  %v1181_v21 = vadd.f32 1.0, %v1865_v14  ;;  %v1200_v24 = vadd.f32 %v1189_v13, %v1144_v17 }
 0x2ff   :  { %v1182_v25 = vadd.f32 1.0, %v1867_v18  ;;  %v1201_v30 = vadd.f32 %v1191_v29, %v1145_v34 }
 0x300   :  { %1870 = vlog2.f32 %v1181_v21  ;;  %v1214_v33 = vsub.f32 %v1200_v24, %v1207_v26 }
 0x301   :  { %1872 = vlog2.f32 %v1182_v25  ;;  %v1215_v41 = vsub.f32 %v1201_v30, %v1208_v38 }
 0x302   :  { %v1869_v32 = vpop.eup %1868  ;;  %v1220_v8 = vadd.f32 %v1219_v37, %v1214_v33 }
 0x303   :  { %v1183_v36 = vadd.f32 1.0, %v1869_v32 }
 0x304   :  { %v1221_v50 = vadd.f32 %v1220_v8, %v1215_v41 }
 0x305   :  { %1874 = vlog2.f32 %v1183_v36 }
 0x306   :  { %v1871_v7 = vpop.eup %1870 }
 0x307   :  { %v1873_v31 = vpop.eup %1872  ;;  %v1193_v19 = vmul.f32 0.6931472, %v1871_v7 }
 0x308   :  { %v1195_v39 = vmul.f32 0.6931472, %v1873_v31 }
 0x309   :  { %v1202_v42 = vadd.f32 %v1193_v19, %v1146_v35 }
 0x30a   :  { %v1203_v49 = vadd.f32 %v1195_v39, %v1147_v46 }
 0x30b   :  { %v1875_v47 = vpop.eup %1874  ;;  %v1216_v48 = vsub.f32 %v1202_v42, %v1209_v45 }
 0x30c   :  { %v1197_v53 = vmul.f32 0.6931472, %v1875_v47  ;;  %v1217_v56 = vsub.f32 %v1203_v49, %v1210_v40 }
 0x30d   :  { %v1222_v20 = vadd.f32 %v1221_v50, %v1216_v48 }
 0x30e   :  { %v1204_v55 = vadd.f32 %v1197_v53, %v1148_v52 }
 0x30f   :  { %v1223_v59 = vadd.f32 %v1222_v20, %v1217_v56 }
 0x310   :  { %v1218_v57 = vsub.f32 %v1204_v55, %v1211_v54 }
 0x312   :  { %v1224_v43 = vsel %vm447_vm0, %v1218_v57, 0.0 }
 0x313   :  { %v1225_v61 = vadd.f32 %v1224_v43, %v1223_v59 }
 0x315   :  { %1226 = vadd.xlane.f32.xlu2 %v1225_v61 }
 0x388   :  { %v1227_v44 = vpop.xlane.xlu2 %1226 }
 0x389   :  { %v1245_v63 = vadd.f32 %v1244_v60, %v1227_v44 }
 0x38b   :  { %1246 = vst [vmem:[#allocation2] sm:$0xff] %v1245_v63 }
 0x38c   :  { %1257 = dma.vmem_to_hbm [thread:$0]  %s1253_s9, 128, %s1255_s18, [#allocation3]  }
 0x38d   :  { %1900 = dma.done.wait [#allocation3], 128  }
 0x38e   :  { %1901 = vsyncadd [#allocation3], 4294967168 }
 0x38f   :  { %1262 = vsyncpa [#allocation3], 1 }

</bundles_post_ra>
